<compile_context>
chip_gen: v5e
topology: v5e:2x2
jax: 0.10.0
libtpu: 0.0.40
codegen_flags: <defaults>
</compile_context>

<pallas_src>
import jax
import jax.numpy as jnp
from jax.experimental import pallas as pl
from jax.experimental.pallas import tpu as pltpu


def _round_up(x, m):
    return (x + m - 1) // m * m


# 64 MiB scoped VMEM: within v7x physical (64 MiB/TC), well above the 16/32 MiB
# defaults on v5e/v6e so big double-buffered tiles stay resident.
_VMEM_LIMIT = 64 * 1024 * 1024


# --------------------------------------------------------------------------- #
# Stage 1: fused per-channel linear. Row-tiled MXU matmul, block-diagonal W.   #
# --------------------------------------------------------------------------- #
def _proj_kernel(x_ref, w_ref, h_ref):
    # x_ref: (TM, Kp) bf16  row tile of [X_0 | X_1 | ... | X_{C-1} | 0-pad]
    # w_ref: (Kp, Fp) bf16  block-diagonal [W_0 ... W_{C-1}] (zeros elsewhere)
    # h_ref: (TM, Fp) bf16  row tile of [X_0 W_0 | ... | X_{C-1} W_{C-1} | 0-pad]
    h_ref[...] = jnp.dot(
        x_ref[...], w_ref[...], preferred_element_type=jnp.float32
    ).astype(h_ref.dtype)


# --------------------------------------------------------------------------- #
# Stage 2: shared GCN aggregation, row- and K-tiled, f32 accumulator,          #
#          bias folded into the epilogue.                                      #
# --------------------------------------------------------------------------- #
def _agg_kernel(a_ref, h_ref, b_ref, o_ref, acc_ref):
    # a_ref:   (TM, TK) bf16  tile of the normalized adjacency
    # h_ref:   (TK, Fp) bf16  K-slice of all channels' projected features
    # b_ref:   (1, Fp)  f32   packed per-channel biases
    # o_ref:   (TM, Fp) f32   lane-dense output slab
    # acc_ref: (TM, Fp) f32   VMEM accumulator (persists across K steps)
    k = pl.program_id(1)

    @pl.when(k == 0)
    def _():
        acc_ref[...] = jnp.zeros_like(acc_ref)

    acc_ref[...] += jnp.dot(
        a_ref[...], h_ref[...], preferred_element_type=jnp.float32
    )

    @pl.when(k == pl.num_programs(1) - 1)
    def _():
        o_ref[...] = (acc_ref[...] + b_ref[...]).astype(o_ref.dtype)


# --------------------------------------------------------------------------- #
# Glue: GCN normalization -> dense A_hat scattered straight into the padded    #
# buffer (scatter stays in plain JAX; it is not kernel work).                  #
# --------------------------------------------------------------------------- #
def _gcn_norm_dense_padded(edge_index, edge_weight, n_nodes, n_pad):
    row, col = edge_index[0], edge_index[1]          # source, target
    is_loop = row == col
    # add_remaining_self_loops: every node gets exactly one self-loop; nodes
    # that already had one keep its (scattered) weight, the rest get weight 1.
    loop_w = jnp.ones((n_nodes,), edge_weight.dtype)
    loop_w = loop_w.at[jnp.where(is_loop, row, n_nodes)].set(
        edge_weight, mode="drop")
    ew_ns = jnp.where(is_loop, jnp.zeros_like(edge_weight), edge_weight)

    loop = jnp.arange(n_nodes, dtype=edge_index.dtype)
    rows = jnp.concatenate([row, loop])
    cols = jnp.concatenate([col, loop])
    ws = jnp.concatenate([ew_ns, loop_w])

    deg = jnp.zeros((n_nodes,), edge_weight.dtype).at[cols].add(ws)
    dis = jnp.where(deg > 0, jax.lax.rsqrt(jnp.where(deg > 0, deg, 1.0)), 0.0)
    norm = dis[rows] * ws * dis[cols]
    # row = source node, col = target node -> A_hat[target, source] = norm,
    # so A_hat @ H matches PyG's source_to_target aggregation.
    return jnp.zeros((n_pad, n_pad), jnp.float32).at[cols, rows].add(norm)


def multi_channel_gcn(xs, weights, biases, edge_index, edge_weight):
    """xs: (C, N, Fin) f32, weights: (C, Fin, Fout) f32, biases: (C, Fout) f32,
    edge_index: (2, E) int32 [source; target], edge_weight: (E,) f32.
    Returns a list of C arrays, each (N, Fout) — same as the PyTorch module."""
    C, N, Fin = xs.shape
    Fout = weights.shape[-1]

    # ---- lane-dense padding: rows to 256 (TM=256 always), lanes to 128 -------
    Np = _round_up(N, 256)
    Kp = _round_up(C * Fin, 128)
    Fp = _round_up(C * Fout, 128)

    # A_hat built directly at padded shape (no exact-size intermediate).
    a_pad = _gcn_norm_dense_padded(edge_index, edge_weight, N, Np)
    a_pad = a_pad.astype(jnp.bfloat16)

    # Pack all channels along lanes: [X_0 | X_1 | ... | X_{C-1} | 0-pad].
    x_cat = jnp.transpose(xs, (1, 0, 2)).reshape(N, C * Fin)
    x_all = jnp.pad(x_cat, ((0, Np - N), (0, Kp - C * Fin))).astype(jnp.bfloat16)

    # Block-diagonal weight packing (static trace-time loop).
    w_all = jnp.zeros((Kp, Fp), jnp.float32)
    for c in range(C):
        w_all = w_all.at[c * Fin:(c + 1) * Fin, c * Fout:(c + 1) * Fout].set(weights[c])
    w_all = w_all.astype(jnp.bfloat16)

    b_all = jnp.zeros((1, Fp), jnp.float32).at[0, : C * Fout].set(biases.reshape(-1))

    TM = 256

    # ---- stage 1: fused per-channel linear, row-tiled & pipelined ------------
    h_all = pl.pallas_call(
        _proj_kernel,
        out_shape=jax.ShapeDtypeStruct((Np, Fp), jnp.bfloat16),
        grid_spec=pltpu.PrefetchScalarGridSpec(
            num_scalar_prefetch=0,
            grid=(Np // TM,),
            in_specs=[
                pl.BlockSpec((TM, Kp), lambda i: (i, 0)),   # X row tile (streams)
                pl.BlockSpec((Kp, Fp), lambda i: (0, 0)),   # block-diag W (constant)
            ],
            out_specs=pl.BlockSpec((TM, Fp), lambda i: (i, 0)),
        ),
        compiler_params=pltpu.CompilerParams(
            dimension_semantics=("parallel",),
            vmem_limit_bytes=_VMEM_LIMIT,
        ),
    )(x_all, w_all)

    # ---- stage 2: A_hat @ H_all + b, row- and K-tiled ------------------------
    TK = 512 if Np % 512 == 0 else 256
    out_pad = pl.pallas_call(
        _agg_kernel,
        out_shape=jax.ShapeDtypeStruct((Np, Fp), jnp.float32),
        grid_spec=pltpu.PrefetchScalarGridSpec(
            num_scalar_prefetch=0,
            grid=(Np // TM, Np // TK),
            in_specs=[
                pl.BlockSpec((TM, TK), lambda i, k: (i, k)),  # A tile (streams)
                pl.BlockSpec((TK, Fp), lambda i, k: (k, 0)),  # H K-slice (streams)
                pl.BlockSpec((1, Fp), lambda i, k: (0, 0)),   # packed biases
            ],
            out_specs=pl.BlockSpec((TM, Fp), lambda i, k: (i, 0)),
            scratch_shapes=[pltpu.VMEM((TM, Fp), jnp.float32)],
        ),
        compiler_params=pltpu.CompilerParams(
            dimension_semantics=("parallel", "arbitrary"),
            vmem_limit_bytes=_VMEM_LIMIT,
        ),
    )(a_pad, h_all, b_all)

    # ---- unpack the padded lane-dense slab into the per-channel output list --
    return [out_pad[:N, c * Fout:(c + 1) * Fout] for c in range(C)]


if __name__ == "__main__":
    key = jax.random.PRNGKey(0)
    num_channels = 10          # matches the script's `num_channels = 10`
    N, Fin, Fout = 16, 8, 16   # small synthetic graph: 16 nodes
    E = 32

    k_x, k_w, k_src, k_dst, k_ew = jax.random.split(key, 5)

    # one feature matrix per channel (the *inputs[:-2] of the PyTorch forward)
    xs = jax.random.normal(k_x, (num_channels, N, Fin), jnp.float32)

    # per-channel GCNConv params: glorot-uniform weight, zero bias (PyG defaults)
    limit = (6.0 / (Fin + Fout)) ** 0.5
    weights = jax.random.uniform(
        k_w, (num_channels, Fin, Fout), jnp.float32, -limit, limit)
    biases = jnp.zeros((num_channels, Fout), jnp.float32)

    # deterministic random graph: inputs[-2] = edge_index, inputs[-1] = edge_weight
    src = jax.random.randint(k_src, (E,), 0, N, jnp.int32)
    dst = jax.random.randint(k_dst, (E,), 0, N, jnp.int32)
    edge_index = jnp.stack([src, dst])
    edge_weight = jax.random.uniform(k_ew, (E,), jnp.float32, 0.5, 1.5)

    outs = multi_channel_gcn(xs, weights, biases, edge_index, edge_weight)
    outs = jax.block_until_ready(outs)
    assert len(outs) == num_channels and outs[0].shape == (N, Fout)

    # loose f32 reference check (the kernels feed the MXU in bf16)
    a_ref = _gcn_norm_dense_padded(edge_index, edge_weight, N, N)
    for c in range(num_channels):
        ref_c = a_ref @ (xs[c] @ weights[c]) + biases[c]
        assert jnp.allclose(outs[c], ref_c, atol=5e-2, rtol=5e-2), f"channel {c} mismatch"

    print("KERNEL_OK")
</pallas_src>

<mosaic_0001>
module attributes {stable_mosaic.version = 11 : i64} {
  func.func @_proj_kernel(%arg0: i32, %arg1: memref<256x128xbf16, #tpu.memory_space<vmem>>, %arg2: memref<128x256xbf16, #tpu.memory_space<vmem>>, %arg3: memref<256x256xbf16, #tpu.memory_space<vmem>>) attributes {dimension_semantics = [#tpu.dimension_semantics<parallel>], iteration_bounds = array<i64: 1>, scalar_prefetch = 0 : i64, scratch_operands = 0 : i64, tpu.core_type = #tpu.core_type<tc>, window_params = [{transform_indices = @transform_0, window_bounds = array<i64: 256, 128>}, {pipeline_mode = #tpu.pipeline_mode<synchronous>, transform_indices = @transform_1, window_bounds = array<i64: 128, 256>}, {transform_indices = @transform_2, window_bounds = array<i64: 256, 256>}]} {
    %c0 = arith.constant 0 : index
    %c0_0 = arith.constant 0 : index
    %0 = vector.load %arg1[%c0, %c0_0] : memref<256x128xbf16, #tpu.memory_space<vmem>>, vector<256x128xbf16>
    %c0_1 = arith.constant 0 : index
    %c0_2 = arith.constant 0 : index
    %1 = vector.load %arg2[%c0_1, %c0_2] : memref<128x256xbf16, #tpu.memory_space<vmem>>, vector<128x256xbf16>
    %cst = arith.constant dense<0.000000e+00> : vector<256x256xf32>
    %2 = tpu.matmul %0, %1, %cst {dimension_numbers = #tpu.dot_dimension_numbers<[1], [0], [0], [1], [0, 0, 1, 1], [], []>} : vector<256x128xbf16>, vector<128x256xbf16>, vector<256x256xf32> -> vector<256x256xf32>
    %3 = arith.truncf %2 : vector<256x256xf32> to vector<256x256xbf16>
    %c0_3 = arith.constant 0 : index
    %c0_4 = arith.constant 0 : index
    %4 = vector.load %arg3[%c0_3, %c0_4] : memref<256x256xbf16, #tpu.memory_space<vmem>>, vector<256x256xbf16>
    tpu.vector_store %arg3[%c0_3, %c0_4], %3 {strides = array<i32>} : memref<256x256xbf16, #tpu.memory_space<vmem>>, vector<256x256xbf16>,
    return
  }
  func.func @transform_0(%arg0: i32) -> (i32, i32) {
    %c0_i32 = arith.constant 0 : i32
    %c0_i32_0 = arith.constant 0 : i32
    return %arg0, %c0_i32 : i32, i32
  }
  func.func @transform_1(%arg0: i32) -> (i32, i32) {
    %c0_i32 = arith.constant 0 : i32
    %c0_i32_0 = arith.constant 0 : i32
    %c0_i32_1 = arith.constant 0 : i32
    return %c0_i32, %c0_i32_0 : i32, i32
  }
  func.func @transform_2(%arg0: i32) -> (i32, i32) {
    %c0_i32 = arith.constant 0 : i32
    %c0_i32_0 = arith.constant 0 : i32
    return %arg0, %c0_i32 : i32, i32
  }
}

</mosaic_0001>

<bundles_post_ra>
// kernel: tpu_custom_call.1
= control target key start
LH: loop header
LB: loop body
LE: loop exit
PB: predicated region body
PF: predicated region fallthrough
CT: control target
= control target key end

     0   :  { %7 = vsyncpa [#allocation3], 0  ;;  %s828_s0 = inlined_call_operand.hbm [shape: bf16[256,128], index: 0, kind: input, shape index: {}]   ;;  %s829_s1 = inlined_call_operand.hbm [shape: bf16[128,256], index: 1, kind: input, shape index: {}]   ;;  %s830_s2 = inlined_call_operand.hbm [shape: bf16[256,256], index: 2, kind: output, shape index: {}]  }
   0x1   :  { %8 = vsyncpa [#allocation6], 0 }
   0x2   :  { %9 = vsyncpa [#allocation4], 0  ;;  %s14_s11 = sshll.u32 %s828_s0, 4  ;;  %s791_s12 = smov [#allocation2]   ;;  %s15_s11 = int_to_ptr.hbm [resolvable:$true] %s14_s11 }
   0x3   :  { %s16_s13 = sshll.u32 %s791_s12, 4  ;;  %s27_s16 = sshll.u32 %s829_s1, 4  ;;  %s17_s13 = int_to_ptr.vmem [resolvable:$true] %s16_s13  ;;  %s28_s16 = int_to_ptr.hbm [resolvable:$true] %s27_s16 }
   0x4   :  { %s792_s17 = smov 64   ;;  %s793_s18 = smov 4  }
   0x5   :  { %22 = dma.hbm_to_vmem [thread:$0]  %s15_s11, 2048, %s17_s13, [#allocation3], %s792_s17, %s792_s17, %s793_s18  }
   0x6   :  { %s794_s19 = smov [#allocation5]   ;;  %s795_s21 = smov 128  }
   0x7   :  { %s29_s20 = sshll.u32 %s794_s19, 4  ;;  %s796_s22 = smov 8   ;;  %s30_s20 = int_to_ptr.vmem [resolvable:$true] %s29_s20 }
   0x8   :  { %35 = dma.hbm_to_vmem [thread:$0]  %s28_s16, 2048, %s30_s20, [#allocation6], %s795_s21, %s795_s21, %s796_s22  }
   0x9   :  { %785 = dma.done.wait [#allocation3], 2048  }
   0xa   :  { %786 = vsyncadd [#allocation3], 4294965248 }
   0xb   :  { %787 = dma.done.wait [#allocation6], 2048  }
   0xc   :  { %788 = vsyncadd [#allocation6], 4294965248  ;;  %v652_v0 = vld [vmem:[#allocation5 + $0x70] sm:$0xf]  ;;  %v689_v1 = vld [vmem:[#allocation5 + $0x74] sm:$0xf0] }
   0xd   :  { %v688_v2 = vld [vmem:[#allocation5 + $0x74] sm:$0xf]  ;;  %v653_v3 = vor.u32 %v689_v1, %v652_v0  ;;  %v654_v4 = vld [vmem:[#allocation5 + $0x78] sm:$0xf0]  ;;  %v644_v5 = vld [vmem:[#allocation5 + $0x60] sm:$0xf] }
   0xe   :  { %v687_v6 = vld [vmem:[#allocation5 + $0x64] sm:$0xf0]  ;;  %v657_v7 = vor.u32 %v688_v2, %v654_v4  ;;  %v686_v8 = vld [vmem:[#allocation5 + $0x64] sm:$0xf]  ;;  %v646_v9 = vld [vmem:[#allocation5 + $0x68] sm:$0xf0] }
   0xf   :  { %268 = vmatpush.bf16.msra.mxu0 %v653_v3  ;;  %690 = vmatpush.bf16.msra.mxu2 %v653_v3  ;;  %v645_v10 = vor.u32 %v687_v6, %v644_v5  ;;  %v649_v11 = vor.u32 %v686_v8, %v646_v9  ;;  %v636_v12 = vld [vmem:[#allocation5 + $0x50] sm:$0xf]  ;;  %v685_v13 = vld [vmem:[#allocation5 + $0x54] sm:$0xf0]  ;;  %v684_v14 = vld [vmem:[#allocation5 + $0x54] sm:$0xf] }
  0x10   :  { %357 = vmatpush.bf16.msra.mxu1 %v657_v7  ;;  %698 = vmatpush.bf16.msra.mxu3 %v657_v7  ;;  %v638_v15 = vld [vmem:[#allocation5 + $0x58] sm:$0xf0]  ;;  %v637_v16 = vor.u32 %v685_v13, %v636_v12  ;;  %v628_v18 = vld [vmem:[#allocation5 + $0x40] sm:$0xf]  ;;  %v683_v19 = vld [vmem:[#allocation5 + $0x44] sm:$0xf0] }
  0x11   :  { %v641_v17 = vor.u32 %v684_v14, %v638_v15  ;;  %v682_v20 = vld [vmem:[#allocation5 + $0x44] sm:$0xf]  ;;  %v630_v21 = vld [vmem:[#allocation5 + $0x48] sm:$0xf0]  ;;  %v629_v22 = vor.u32 %v683_v19, %v628_v18  ;;  %v620_v24 = vld [vmem:[#allocation5 + $0x30] sm:$0xf] }
  0x12   :  { %v633_v23 = vor.u32 %v682_v20, %v630_v21  ;;  %v681_v25 = vld [vmem:[#allocation5 + $0x34] sm:$0xf0]  ;;  %v680_v26 = vld [vmem:[#allocation5 + $0x34] sm:$0xf]  ;;  %v622_v27 = vld [vmem:[#allocation5 + $0x38] sm:$0xf0] }
  0x13   :  { %269 = vmatpush.bf16.msra.mxu0 %v645_v10  ;;  %691 = vmatpush.bf16.msra.mxu2 %v645_v10  ;;  %v621_v28 = vor.u32 %v681_v25, %v620_v24  ;;  %v625_v29 = vor.u32 %v680_v26, %v622_v27  ;;  %v612_v30 = vld [vmem:[#allocation5 + $0x20] sm:$0xf]  ;;  %v679_v31 = vld [vmem:[#allocation5 + $0x24] sm:$0xf0]  ;;  %v678_v32 = vld [vmem:[#allocation5 + $0x24] sm:$0xf] }
  0x14   :  { %358 = vmatpush.bf16.msra.mxu1 %v649_v11  ;;  %699 = vmatpush.bf16.msra.mxu3 %v649_v11  ;;  %v614_v33 = vld [vmem:[#allocation5 + $0x28] sm:$0xf0]  ;;  %v613_v34 = vor.u32 %v679_v31, %v612_v30  ;;  %v604_v36 = vld [vmem:[#allocation5 + $0x10] sm:$0xf]  ;;  %v677_v37 = vld [vmem:[#allocation5 + $0x14] sm:$0xf0] }
  0x15   :  { %v617_v35 = vor.u32 %v678_v32, %v614_v33  ;;  %v676_v38 = vld [vmem:[#allocation5 + $0x14] sm:$0xf]  ;;  %v606_v39 = vld [vmem:[#allocation5 + $0x18] sm:$0xf0]  ;;  %v605_v40 = vor.u32 %v677_v37, %v604_v36  ;;  %v596_v42 = vld [vmem:[#allocation5] sm:$0xf] }
  0x16   :  { %v609_v41 = vor.u32 %v676_v38, %v606_v39  ;;  %v675_v43 = vld [vmem:[#allocation5 + $0x4] sm:$0xf0]  ;;  %v674_v44 = vld [vmem:[#allocation5 + $0x4] sm:$0xf]  ;;  %v598_v45 = vld [vmem:[#allocation5 + $0x8] sm:$0xf0] }
  0x17   :  { %270 = vmatpush.bf16.msra.mxu0 %v637_v16  ;;  %692 = vmatpush.bf16.msra.mxu2 %v637_v16  ;;  %v597_v46 = vor.u32 %v675_v43, %v596_v42  ;;  %v601_v47 = vor.u32 %v674_v44, %v598_v45  ;;  %v658_v48 = vld [vmem:[#allocation2] sm:$0xff]  ;;  %v659_v50 = vld [vmem:[#allocation2 + $0x8] sm:$0xff]  ;;  %v660_v52 = vld [vmem:[#allocation2 + $0x10] sm:$0xff]  ;;  %s797_s0 = smov [#allocation7]   ;;  %s516_s25 = sshll.u32 %s830_s2, 4  ;;  %s517_s25 = int_to_ptr.hbm [resolvable:$true] %s516_s25 }
  0x18   :  { %359 = vmatpush.bf16.msra.mxu1 %v641_v17  ;;  %700 = vmatpush.bf16.msra.mxu3 %v641_v17  ;;  %v666_v49 = vld [vmem:[#allocation2 + $0x40] sm:$0xff]  ;;  %v667_v51 = vld [vmem:[#allocation2 + $0x48] sm:$0xff]  ;;  %v668_v53 = vld [vmem:[#allocation2 + $0x50] sm:$0xff]  ;;  %s514_s1 = sshll.u32 %s797_s0, 4  ;;  %s515_s1 = int_to_ptr.vmem [resolvable:$true] %s514_s1 }
  0x19   :  { %v661_v54 = vld [vmem:[#allocation2 + $0x18] sm:$0xff]  ;;  %v662_v56 = vld [vmem:[#allocation2 + $0x20] sm:$0xff]  ;;  %v663_v58 = vld [vmem:[#allocation2 + $0x28] sm:$0xff] }
  0x1a   :  { %v669_v55 = vld [vmem:[#allocation2 + $0x58] sm:$0xff]  ;;  %v670_v57 = vld [vmem:[#allocation2 + $0x60] sm:$0xff]  ;;  %v671_v59 = vld [vmem:[#allocation2 + $0x68] sm:$0xff] }
  0x1b   :  { %271 = vmatpush.bf16.msra.mxu0 %v629_v22  ;;  %693 = vmatpush.bf16.msra.mxu2 %v629_v22  ;;  %v664_v60 = vld [vmem:[#allocation2 + $0x30] sm:$0xff]  ;;  %v665_v62 = vld [vmem:[#allocation2 + $0x38] sm:$0xff] }
  0x1c   :  { %360 = vmatpush.bf16.msra.mxu1 %v633_v23  ;;  %701 = vmatpush.bf16.msra.mxu3 %v633_v23  ;;  %v672_v61 = vld [vmem:[#allocation2 + $0x70] sm:$0xff]  ;;  %v673_v63 = vld [vmem:[#allocation2 + $0x78] sm:$0xff] }
  0x1f   :  { %272 = vmatpush.bf16.msra.mxu0 %v621_v28  ;;  %694 = vmatpush.bf16.msra.mxu2 %v621_v28 }
  0x20   :  { %361 = vmatpush.bf16.msra.mxu1 %v625_v29  ;;  %702 = vmatpush.bf16.msra.mxu3 %v625_v29 }
  0x23   :  { %273 = vmatpush.bf16.msra.mxu0 %v613_v34  ;;  %695 = vmatpush.bf16.msra.mxu2 %v613_v34 }
  0x24   :  { %362 = vmatpush.bf16.msra.mxu1 %v617_v35  ;;  %703 = vmatpush.bf16.msra.mxu3 %v617_v35 }
  0x27   :  { %274 = vmatpush.bf16.msra.mxu0 %v605_v40  ;;  %696 = vmatpush.bf16.msra.mxu2 %v605_v40 }
  0x28   :  { %363 = vmatpush.bf16.msra.mxu1 %v609_v41  ;;  %704 = vmatpush.bf16.msra.mxu3 %v609_v41 }
  0x2b   :  { %275 = vmatpush.bf16.msra.mxu0 %v597_v46  ;;  %697 = vmatpush.bf16.msra.mxu2 %v597_v46 }
  0x2c   :  { %364 = vmatpush.bf16.msra.mxu1 %v601_v47  ;;  %705 = vmatpush.bf16.msra.mxu3 %v601_v47 }
  0x2e   :  { %276 = vmatmul.bf16.vlgmr.msra.gmra.mxu0 %v658_v48  ;;  %316 = vmatmul.bf16.vlgmr.msra.gmra.mxu2 %v666_v49 }
  0x2f   :  { %365 = vmatmul.bf16.vlgmr.msra.gmra.mxu1 %v658_v48  ;;  %405 = vmatmul.bf16.vlgmr.msra.gmra.mxu3 %v666_v49 }
  0x3e   :  { %281 = vmatmul.bf16.gmra.mxu0 %v659_v50  ;;  %321 = vmatmul.bf16.gmra.mxu2 %v667_v51 }
  0x3f   :  { %370 = vmatmul.bf16.gmra.mxu1 %v659_v50  ;;  %410 = vmatmul.bf16.gmra.mxu3 %v667_v51 }
  0x4e   :  { %286 = vmatmul.bf16.gmra.mxu0 %v660_v52  ;;  %326 = vmatmul.bf16.gmra.mxu2 %v668_v53 }
  0x4f   :  { %375 = vmatmul.bf16.gmra.mxu1 %v660_v52  ;;  %415 = vmatmul.bf16.gmra.mxu3 %v668_v53 }
  0x5e   :  { %291 = vmatmul.bf16.gmra.mxu0 %v661_v54  ;;  %331 = vmatmul.bf16.gmra.mxu2 %v669_v55 }
  0x5f   :  { %380 = vmatmul.bf16.gmra.mxu1 %v661_v54  ;;  %420 = vmatmul.bf16.gmra.mxu3 %v669_v55 }
  0x6e   :  { %296 = vmatmul.bf16.gmra.mxu0 %v662_v56  ;;  %336 = vmatmul.bf16.gmra.mxu2 %v670_v57 }
  0x6f   :  { %385 = vmatmul.bf16.gmra.mxu1 %v662_v56  ;;  %425 = vmatmul.bf16.gmra.mxu3 %v670_v57 }
  0x7e   :  { %301 = vmatmul.bf16.gmra.mxu0 %v663_v58  ;;  %341 = vmatmul.bf16.gmra.mxu2 %v671_v59 }
  0x7f   :  { %390 = vmatmul.bf16.gmra.mxu1 %v663_v58  ;;  %430 = vmatmul.bf16.gmra.mxu3 %v671_v59 }
  0x8e   :  { %306 = vmatmul.bf16.gmra.mxu0 %v664_v60  ;;  %346 = vmatmul.bf16.gmra.mxu2 %v672_v61 }
  0x8f   :  { %395 = vmatmul.bf16.gmra.mxu1 %v664_v60  ;;  %435 = vmatmul.bf16.gmra.mxu3 %v672_v61 }
  0x9e   :  { %311 = vmatmul.bf16.gmra.mxu0 %v665_v62  ;;  %351 = vmatmul.bf16.gmra.mxu2 %v673_v63 }
  0x9f   :  { %400 = vmatmul.bf16.gmra.mxu1 %v665_v62  ;;  %440 = vmatmul.bf16.gmra.mxu3 %v673_v63 }
  0xab   :  { %v277_v0 = vpop.f32.mrf.mxu0 }
  0xac   :  { %v366_v1 = vpop.f32.mrf.mxu1 }
  0xad   :  { %v446_v2 = vpack.c.bf16 %v366_v1, %v277_v0 }
  0xaf   :  { %478 = vst [vmem:[#allocation7] sm:$0xff] %v446_v2 }
  0xb1   :  { %v317_v3 = vpop.f32.mrf.mxu2 }
  0xb2   :  { %v406_v4 = vpop.f32.mrf.mxu3 }
  0xb3   :  { %v462_v5 = vpack.c.bf16 %v406_v4, %v317_v3  ;;  %v279_v6 = vpop.f32.mrf.mxu0 }
  0xb4   :  { %v368_v7 = vpop.f32.mrf.mxu1 }
  0xb5   :  { %494 = vst [vmem:[#allocation7 + $0x80] sm:$0xff] %v462_v5  ;;  %v447_v8 = vpack.c.bf16 %v368_v7, %v279_v6 }
  0xb7   :  { %479 = vst [vmem:[#allocation7 + $0x8] sm:$0xff] %v447_v8 }
  0xb9   :  { %v319_v9 = vpop.f32.mrf.mxu2 }
  0xba   :  { %v408_v10 = vpop.f32.mrf.mxu3 }
  0xbb   :  { %v463_v11 = vpack.c.bf16 %v408_v10, %v319_v9  ;;  %v282_v12 = vpop.f32.mrf.mxu0 }
  0xbc   :  { %v371_v13 = vpop.f32.mrf.mxu1 }
  0xbd   :  { %495 = vst [vmem:[#allocation7 + $0x88] sm:$0xff] %v463_v11  ;;  %v448_v14 = vpack.c.bf16 %v371_v13, %v282_v12 }
  0xbf   :  { %480 = vst [vmem:[#allocation7 + $0x10] sm:$0xff] %v448_v14 }
  0xc1   :  { %v322_v15 = vpop.f32.mrf.mxu2 }
  0xc2   :  { %v411_v16 = vpop.f32.mrf.mxu3 }
  0xc3   :  { %v464_v17 = vpack.c.bf16 %v411_v16, %v322_v15  ;;  %v284_v18 = vpop.f32.mrf.mxu0 }
  0xc4   :  { %v373_v19 = vpop.f32.mrf.mxu1 }
  0xc5   :  { %496 = vst [vmem:[#allocation7 + $0x90] sm:$0xff] %v464_v17  ;;  %v449_v20 = vpack.c.bf16 %v373_v19, %v284_v18 }
  0xc7   :  { %481 = vst [vmem:[#allocation7 + $0x18] sm:$0xff] %v449_v20 }
  0xc9   :  { %v324_v21 = vpop.f32.mrf.mxu2 }
  0xca   :  { %v413_v22 = vpop.f32.mrf.mxu3 }
  0xcb   :  { %v465_v23 = vpack.c.bf16 %v413_v22, %v324_v21  ;;  %v287_v24 = vpop.f32.mrf.mxu0 }
  0xcc   :  { %v376_v25 = vpop.f32.mrf.mxu1 }
  0xcd   :  { %497 = vst [vmem:[#allocation7 + $0x98] sm:$0xff] %v465_v23  ;;  %v450_v26 = vpack.c.bf16 %v376_v25, %v287_v24 }
  0xcf   :  { %482 = vst [vmem:[#allocation7 + $0x20] sm:$0xff] %v450_v26 }
  0xd1   :  { %v327_v27 = vpop.f32.mrf.mxu2 }
  0xd2   :  { %v416_v28 = vpop.f32.mrf.mxu3 }
  0xd3   :  { %v466_v29 = vpack.c.bf16 %v416_v28, %v327_v27  ;;  %v289_v30 = vpop.f32.mrf.mxu0 }
  0xd4   :  { %v378_v31 = vpop.f32.mrf.mxu1 }
  0xd5   :  { %498 = vst [vmem:[#allocation7 + $0xa0] sm:$0xff] %v466_v29  ;;  %v451_v32 = vpack.c.bf16 %v378_v31, %v289_v30 }
  0xd7   :  { %483 = vst [vmem:[#allocation7 + $0x28] sm:$0xff] %v451_v32 }
  0xd9   :  { %v329_v33 = vpop.f32.mrf.mxu2 }
  0xda   :  { %v418_v34 = vpop.f32.mrf.mxu3 }
  0xdb   :  { %v467_v35 = vpack.c.bf16 %v418_v34, %v329_v33  ;;  %v292_v36 = vpop.f32.mrf.mxu0 }
  0xdc   :  { %v381_v37 = vpop.f32.mrf.mxu1 }
  0xdd   :  { %499 = vst [vmem:[#allocation7 + $0xa8] sm:$0xff] %v467_v35  ;;  %v452_v38 = vpack.c.bf16 %v381_v37, %v292_v36 }
  0xdf   :  { %484 = vst [vmem:[#allocation7 + $0x30] sm:$0xff] %v452_v38 }
  0xe1   :  { %v332_v39 = vpop.f32.mrf.mxu2 }
  0xe2   :  { %v421_v40 = vpop.f32.mrf.mxu3 }
  0xe3   :  { %v468_v41 = vpack.c.bf16 %v421_v40, %v332_v39  ;;  %v294_v42 = vpop.f32.mrf.mxu0 }
  0xe4   :  { %v383_v43 = vpop.f32.mrf.mxu1 }
  0xe5   :  { %500 = vst [vmem:[#allocation7 + $0xb0] sm:$0xff] %v468_v41  ;;  %v453_v44 = vpack.c.bf16 %v383_v43, %v294_v42 }
  0xe7   :  { %485 = vst [vmem:[#allocation7 + $0x38] sm:$0xff] %v453_v44 }
  0xe9   :  { %v334_v45 = vpop.f32.mrf.mxu2 }
  0xea   :  { %v423_v46 = vpop.f32.mrf.mxu3 }
  0xeb   :  { %v469_v47 = vpack.c.bf16 %v423_v46, %v334_v45  ;;  %v297_v48 = vpop.f32.mrf.mxu0 }
  0xec   :  { %v386_v49 = vpop.f32.mrf.mxu1 }
  0xed   :  { %501 = vst [vmem:[#allocation7 + $0xb8] sm:$0xff] %v469_v47  ;;  %v454_v50 = vpack.c.bf16 %v386_v49, %v297_v48 }
  0xef   :  { %486 = vst [vmem:[#allocation7 + $0x40] sm:$0xff] %v454_v50 }
  0xf1   :  { %v337_v51 = vpop.f32.mrf.mxu2 }
  0xf2   :  { %v426_v52 = vpop.f32.mrf.mxu3 }
  0xf3   :  { %v470_v53 = vpack.c.bf16 %v426_v52, %v337_v51  ;;  %v299_v54 = vpop.f32.mrf.mxu0 }
  0xf4   :  { %v388_v55 = vpop.f32.mrf.mxu1 }
  0xf5   :  { %502 = vst [vmem:[#allocation7 + $0xc0] sm:$0xff] %v470_v53  ;;  %v455_v56 = vpack.c.bf16 %v388_v55, %v299_v54 }
  0xf7   :  { %487 = vst [vmem:[#allocation7 + $0x48] sm:$0xff] %v455_v56 }
  0xf9   :  { %v339_v57 = vpop.f32.mrf.mxu2 }
  0xfa   :  { %v428_v58 = vpop.f32.mrf.mxu3 }
  0xfb   :  { %v471_v59 = vpack.c.bf16 %v428_v58, %v339_v57  ;;  %v302_v60 = vpop.f32.mrf.mxu0 }
  0xfc   :  { %v391_v61 = vpop.f32.mrf.mxu1 }
  0xfd   :  { %503 = vst [vmem:[#allocation7 + $0xc8] sm:$0xff] %v471_v59  ;;  %v456_v62 = vpack.c.bf16 %v391_v61, %v302_v60 }
  0xff   :  { %488 = vst [vmem:[#allocation7 + $0x50] sm:$0xff] %v456_v62 }
 0x101   :  { %v342_v63 = vpop.f32.mrf.mxu2 }
 0x102   :  { %v431_v0 = vpop.f32.mrf.mxu3 }
 0x103   :  { %v472_v1 = vpack.c.bf16 %v431_v0, %v342_v63  ;;  %v304_v2 = vpop.f32.mrf.mxu0 }
 0x104   :  { %v393_v3 = vpop.f32.mrf.mxu1 }
 0x105   :  { %504 = vst [vmem:[#allocation7 + $0xd0] sm:$0xff] %v472_v1  ;;  %v457_v4 = vpack.c.bf16 %v393_v3, %v304_v2 }
 0x107   :  { %489 = vst [vmem:[#allocation7 + $0x58] sm:$0xff] %v457_v4 }
 0x109   :  { %v344_v5 = vpop.f32.mrf.mxu2 }
 0x10a   :  { %v433_v6 = vpop.f32.mrf.mxu3 }
 0x10b   :  { %v473_v7 = vpack.c.bf16 %v433_v6, %v344_v5  ;;  %v307_v8 = vpop.f32.mrf.mxu0 }
 0x10c   :  { %v396_v9 = vpop.f32.mrf.mxu1 }
 0x10d   :  { %505 = vst [vmem:[#allocation7 + $0xd8] sm:$0xff] %v473_v7  ;;  %v458_v10 = vpack.c.bf16 %v396_v9, %v307_v8 }
 0x10f   :  { %490 = vst [vmem:[#allocation7 + $0x60] sm:$0xff] %v458_v10 }
 0x111   :  { %v347_v11 = vpop.f32.mrf.mxu2 }
 0x112   :  { %v436_v12 = vpop.f32.mrf.mxu3 }
 0x113   :  { %v474_v13 = vpack.c.bf16 %v436_v12, %v347_v11  ;;  %v309_v14 = vpop.f32.mrf.mxu0 }
 0x114   :  { %v398_v15 = vpop.f32.mrf.mxu1 }
 0x115   :  { %506 = vst [vmem:[#allocation7 + $0xe0] sm:$0xff] %v474_v13  ;;  %v459_v16 = vpack.c.bf16 %v398_v15, %v309_v14 }
 0x117   :  { %491 = vst [vmem:[#allocation7 + $0x68] sm:$0xff] %v459_v16 }
 0x119   :  { %v349_v17 = vpop.f32.mrf.mxu2 }
 0x11a   :  { %v438_v18 = vpop.f32.mrf.mxu3 }
 0x11b   :  { %v475_v19 = vpack.c.bf16 %v438_v18, %v349_v17  ;;  %v312_v20 = vpop.f32.mrf.mxu0 }
 0x11c   :  { %v401_v21 = vpop.f32.mrf.mxu1 }
 0x11d   :  { %507 = vst [vmem:[#allocation7 + $0xe8] sm:$0xff] %v475_v19  ;;  %v460_v22 = vpack.c.bf16 %v401_v21, %v312_v20 }
 0x11f   :  { %492 = vst [vmem:[#allocation7 + $0x70] sm:$0xff] %v460_v22 }
 0x121   :  { %v352_v23 = vpop.f32.mrf.mxu2 }
 0x122   :  { %v441_v24 = vpop.f32.mrf.mxu3 }
 0x123   :  { %v476_v25 = vpack.c.bf16 %v441_v24, %v352_v23  ;;  %v314_v26 = vpop.f32.mrf.mxu0 }
 0x124   :  { %v403_v27 = vpop.f32.mrf.mxu1 }
 0x125   :  { %508 = vst [vmem:[#allocation7 + $0xf0] sm:$0xff] %v476_v25  ;;  %v461_v28 = vpack.c.bf16 %v403_v27, %v314_v26 }
 0x127   :  { %493 = vst [vmem:[#allocation7 + $0x78] sm:$0xff] %v461_v28 }
 0x129   :  { %v354_v29 = vpop.f32.mrf.mxu2 }
 0x12a   :  { %v443_v30 = vpop.f32.mrf.mxu3 }
 0x12b   :  { %v477_v31 = vpack.c.bf16 %v443_v30, %v354_v29 }
 0x12d   :  { %509 = vst [vmem:[#allocation7 + $0xf8] sm:$0xff] %v477_v31 }
 0x12e   :  { %522 = dma.vmem_to_hbm [thread:$0]  %s515_s1, 4096, %s517_s25, [#allocation4], %s795_s21, %s795_s21, %s796_s22  }
 0x12f   :  { %789 = dma.done.wait [#allocation4], 4096  }
 0x130   :  { %790 = vsyncadd [#allocation4], 4294963200 }
 0x131   :  { %527 = vsyncpa [#allocation3], 1 }
 0x132   :  { %528 = vsyncpa [#allocation6], 1 }
 0x133   :  { %529 = vsyncpa [#allocation4], 1 }

</bundles_post_ra>
